<compile_context>
chip_gen: v5e
topology: v5e:2x2
jax: 0.10.0
libtpu: 0.0.40
codegen_flags: <defaults>
</compile_context>

<pallas_src>
import jax
import jax.numpy as jnp
from jax.experimental import pallas as pl
from jax.experimental.pallas import tpu as pltpu


_LANES = 1024          # last block dim: large multiple of 128 -> lane-dense vld/vst
_MAX_TILE_ROWS = 256   # 256 x 1024 f32 = 1 MiB/input block; 2 inputs x 2 bufs = 4 MiB


def _round_up(x, m):
    return (x + m - 1) // m * m


def _sse_kernel(o_ref, t_ref, out_ref, acc_ref):
    """Sum of squared errors with a VMEM vector accumulator.

    Grid = (parallel_blocks, reduction_steps). The accumulator is zeroed at the
    first reduction step, updated with pure VPU work each step, and reduced
    cross-lane exactly once at the last step of each parallel block.
    """
    r = pl.program_id(1)

    @pl.when(r == 0)
    def _():
        acc_ref[...] = jnp.zeros_like(acc_ref)

    d = o_ref[...].astype(jnp.float32) - t_ref[...].astype(jnp.float32)
    acc_ref[...] += d * d

    @pl.when(r == pl.num_programs(1) - 1)
    def _():
        s = jnp.sum(acc_ref[...])
        # Lane-dense (1, 8, 128) write; wrapper picks [p, 0, 0].
        out_ref[...] = jnp.full(out_ref.shape, s, dtype=jnp.float32)


def _sse_pallas(output, target):
    """Sum of squared errors, reduced on-chip. Accepts any shape."""
    assert output.shape == target.shape
    total = output.size
    itemsize = jnp.dtype(output.dtype).itemsize

    o_flat = output.reshape(-1)
    t_flat = target.reshape(-1)

    # Lane-dense 2D view: (rows, 1024), zero-padded (zeros contribute 0 to SSE).
    rows = pl.cdiv(total, _LANES)
    tile_r = min(_MAX_TILE_ROWS, _round_up(rows, 8))
    num_tiles = pl.cdiv(rows, tile_r)
    n_par = 2 if num_tiles >= 2 else 1          # give both v7x TensorCores work
    n_red = pl.cdiv(num_tiles, n_par)
    padded_rows = n_par * n_red * tile_r
    padded_total = padded_rows * _LANES

    pad = padded_total - total
    if pad:
        o_flat = jnp.pad(o_flat, (0, pad))
        t_flat = jnp.pad(t_flat, (0, pad))
    o2 = o_flat.reshape(padded_rows, _LANES)
    t2 = t_flat.reshape(padded_rows, _LANES)

    def in_map(p, r, n_red=n_red):
        return (p * n_red + r, 0)

    partials = pl.pallas_call(
        _sse_kernel,
        out_shape=jax.ShapeDtypeStruct((n_par, 8, 128), jnp.float32),
        grid_spec=pltpu.PrefetchScalarGridSpec(
            num_scalar_prefetch=0,
            grid=(n_par, n_red),
            in_specs=[
                pl.BlockSpec((tile_r, _LANES), in_map),
                pl.BlockSpec((tile_r, _LANES), in_map),
            ],
            out_specs=pl.BlockSpec((1, 8, 128), lambda p, r: (p, 0, 0)),
            scratch_shapes=[pltpu.VMEM((tile_r, _LANES), jnp.float32)],
        ),
        compiler_params=pltpu.CompilerParams(
            dimension_semantics=("parallel", "arbitrary")),
        cost_estimate=pl.CostEstimate(
            flops=3 * total,
            transcendentals=0,
            bytes_accessed=2 * total * itemsize),
    )(o2, t2)

    # Tiny final combine of the per-parallel-block partial sums in plain JAX.
    return jnp.sum(partials[:, 0, 0])


class BaseLossJax:
    """Mirror of PyTorch BaseLoss (identity / zero loss, factor 0)."""

    def __init__(self):
        self.loss_dict = {}
        self._factor = 0.0
        self.name = "BaseLoss"

    def _forward(self, output, target):
        return jnp.float32(0.0)

    def forward(self, output, target):
        total_loss = jnp.float32(0.0)
        current_loss = self._forward(output, target)
        total_loss = total_loss + current_loss * self._factor
        self.loss_dict["total"] = total_loss
        return total_loss


class MSELossDecoratorJax:
    """Mirror of PyTorch BaseLossDecorator with `_forward` = MSE (Pallas)."""

    def __init__(self, base_loss=None, factor=1.0):
        self.base_loss = base_loss if base_loss is not None else BaseLossJax()
        self.loss_dict = self.base_loss.loss_dict
        self._factor = jnp.float32(factor)
        self.name = "MSELossDecorator"

    def _forward(self, output, target):
        num_el = output.size
        sse = _sse_pallas(output, target)
        return sse / jnp.float32(num_el)

    def forward(self, output, target):
        total_loss = self.base_loss.forward(output=output, target=target)
        current_loss = self._forward(output=output, target=target)
        total_loss = total_loss + current_loss * self._factor
        self.loss_dict["total"] = total_loss
        return total_loss


if __name__ == "__main__":
    key = jax.random.PRNGKey(0)
    k1, k2 = jax.random.split(key)
    # NCHW, small shapes
    output = jax.random.normal(k1, (2, 4, 16, 16), dtype=jnp.float32)
    target = jax.random.normal(k2, (2, 4, 16, 16), dtype=jnp.float32)

    loss_mod = MSELossDecoratorJax(base_loss=BaseLossJax(), factor=1.0)
    total = loss_mod.forward(output, target)
    total = jax.block_until_ready(total)

    # reference check in plain JAX
    ref = jnp.mean((output - target) ** 2)
    assert jnp.allclose(total, ref, rtol=1e-5, atol=1e-5), (total, ref)

    print("KERNEL_OK")
</pallas_src>

<mosaic_0001>
module attributes {stable_mosaic.version = 11 : i64} {
  func.func @_sse_kernel(%arg0: i32, %arg1: i32, %arg2: memref<8x1024xf32, #tpu.memory_space<vmem>>, %arg3: memref<8x1024xf32, #tpu.memory_space<vmem>>, %arg4: memref<1x8x128xf32, #tpu.memory_space<vmem>>, %arg5: memref<8x1024xf32, #tpu.memory_space<vmem>>) attributes {dimension_semantics = [#tpu.dimension_semantics<parallel>, #tpu.dimension_semantics<arbitrary>], iteration_bounds = array<i64: 1, 1>, scalar_prefetch = 0 : i64, scratch_operands = 1 : i64, tpu.core_type = #tpu.core_type<tc>, window_params = [{transform_indices = @transform_0, window_bounds = array<i64: 8, 1024>}, {transform_indices = @transform_1, window_bounds = array<i64: 8, 1024>}, {transform_indices = @transform_2, window_bounds = array<i64: 1, 8, 128>}]} {
    %c0_i32 = arith.constant 0 : i32
    %0 = arith.cmpi eq, %arg1, %c0_i32 : i32
    %1 = arith.extui %0 : i1 to i32
    %c0_i32_0 = arith.constant 0 : i32
    %2 = arith.cmpi ne, %1, %c0_i32_0 : i32
    scf.if %2 {
      %cst = arith.constant 0.000000e+00 : f32
      %13 = vector.broadcast %cst : f32 to vector<8x1024xf32>
      %c0_10 = arith.constant 0 : index
      %c0_11 = arith.constant 0 : index
      %14 = vector.load %arg5[%c0_10, %c0_11] : memref<8x1024xf32, #tpu.memory_space<vmem>>, vector<8x1024xf32>
      tpu.vector_store %arg5[%c0_10, %c0_11], %13 {strides = array<i32>} : memref<8x1024xf32, #tpu.memory_space<vmem>>, vector<8x1024xf32>,
    } else {
    }
    %c0 = arith.constant 0 : index
    %c0_1 = arith.constant 0 : index
    %3 = vector.load %arg2[%c0, %c0_1] : memref<8x1024xf32, #tpu.memory_space<vmem>>, vector<8x1024xf32>
    %c0_2 = arith.constant 0 : index
    %c0_3 = arith.constant 0 : index
    %4 = vector.load %arg3[%c0_2, %c0_3] : memref<8x1024xf32, #tpu.memory_space<vmem>>, vector<8x1024xf32>
    %5 = arith.subf %3, %4 : vector<8x1024xf32>
    %c0_4 = arith.constant 0 : index
    %c0_5 = arith.constant 0 : index
    %6 = vector.load %arg5[%c0_4, %c0_5] : memref<8x1024xf32, #tpu.memory_space<vmem>>, vector<8x1024xf32>
    %7 = arith.mulf %5, %5 : vector<8x1024xf32>
    %8 = arith.addf %6, %7 : vector<8x1024xf32>
    %c0_6 = arith.constant 0 : index
    %c0_7 = arith.constant 0 : index
    %9 = vector.load %arg5[%c0_6, %c0_7] : memref<8x1024xf32, #tpu.memory_space<vmem>>, vector<8x1024xf32>
    tpu.vector_store %arg5[%c0_6, %c0_7], %8 {strides = array<i32>} : memref<8x1024xf32, #tpu.memory_space<vmem>>, vector<8x1024xf32>,
    %c0_i32_8 = arith.constant 0 : i32
    %10 = arith.cmpi eq, %arg1, %c0_i32_8 : i32
    %11 = arith.extui %10 : i1 to i32
    %c0_i32_9 = arith.constant 0 : i32
    %12 = arith.cmpi ne, %11, %c0_i32_9 : i32
    scf.if %12 {
      %c0_10 = arith.constant 0 : index
      %c0_11 = arith.constant 0 : index
      %13 = vector.load %arg5[%c0_10, %c0_11] : memref<8x1024xf32, #tpu.memory_space<vmem>>, vector<8x1024xf32>
      %14 = vector.shape_cast %13 : vector<8x1024xf32> to vector<1x8x1024xf32>
      %cst = arith.constant dense<0.000000e+00> : vector<1xf32>
      %15 = vector.multi_reduction <add>, %14, %cst [1, 2] : vector<1x8x1024xf32> to vector<1xf32>
      %16 = vector.shape_cast %15 : vector<1xf32> to vector<1x1x1xf32>
      %17 = vector.extract %16[0, 0, 0] : f32 from vector<1x1x1xf32>
      %18 = vector.broadcast %17 : f32 to vector<1x8x128xf32>
      %c0_12 = arith.constant 0 : index
      %c0_13 = arith.constant 0 : index
      %c0_14 = arith.constant 0 : index
      %19 = vector.load %arg4[%c0_12, %c0_13, %c0_14] : memref<1x8x128xf32, #tpu.memory_space<vmem>>, vector<1x8x128xf32>
      tpu.vector_store %arg4[%c0_12, %c0_13, %c0_14], %18 {strides = array<i32>} : memref<1x8x128xf32, #tpu.memory_space<vmem>>, vector<1x8x128xf32>,
    } else {
    }
    return
  }
  func.func @transform_0(%arg0: i32, %arg1: i32) -> (i32, i32) {
    %c1_i32 = arith.constant 1 : i32
    %0 = arith.muli %arg0, %c1_i32 : i32
    %1 = arith.addi %0, %arg1 : i32
    %c0_i32 = arith.constant 0 : i32
    %c0_i32_0 = arith.constant 0 : i32
    return %1, %c0_i32 : i32, i32
  }
  func.func @transform_1(%arg0: i32, %arg1: i32) -> (i32, i32) {
    %c1_i32 = arith.constant 1 : i32
    %0 = arith.muli %arg0, %c1_i32 : i32
    %1 = arith.addi %0, %arg1 : i32
    %c0_i32 = arith.constant 0 : i32
    %c0_i32_0 = arith.constant 0 : i32
    return %1, %c0_i32 : i32, i32
  }
  func.func @transform_2(%arg0: i32, %arg1: i32) -> (i32, i32, i32) {
    %c0_i32 = arith.constant 0 : i32
    %c0_i32_0 = arith.constant 0 : i32
    %c0_i32_1 = arith.constant 0 : i32
    return %arg0, %c0_i32, %c0_i32_0 : i32, i32, i32
  }
}

</mosaic_0001>

<bundles_post_ra>
// kernel: tpu_custom_call.1
= control target key start
LH: loop header
LB: loop body
LE: loop exit
PB: predicated region body
PF: predicated region fallthrough
CT: control target
= control target key end

     0   :  { %7 = vsyncpa [#allocation4], 0  ;;  %s275_s0 = inlined_call_operand.hbm [shape: f32[8,1024], index: 0, kind: input, shape index: {}]   ;;  %s276_s1 = inlined_call_operand.hbm [shape: f32[8,1024], index: 1, kind: input, shape index: {}]   ;;  %s277_s2 = inlined_call_operand.hbm [shape: f32[1,8,128], index: 2, kind: output, shape index: {}]  }
   0x1   :  { %8 = vsyncpa [#allocation7], 0 }
   0x2   :  { %9 = vsyncpa [#allocation5], 0  ;;  %s19_s11 = sshll.u32 %s275_s0, 4  ;;  %s248_s12 = smov [#allocation3]   ;;  %s20_s11 = int_to_ptr.hbm [resolvable:$true] %s19_s11 }
   0x3   :  { %s21_s13 = sshll.u32 %s248_s12, 4  ;;  %s34_s16 = sshll.u32 %s276_s1, 4  ;;  %s22_s13 = int_to_ptr.vmem [resolvable:$true] %s21_s13  ;;  %s35_s16 = int_to_ptr.hbm [resolvable:$true] %s34_s16 }
   0x4   :  { %24 = dma.hbm_to_vmem [thread:$0]  %s20_s11, 1024, %s22_s13, [#allocation4]  }
   0x5   :  { %s249_s17 = smov [#allocation6]  }
   0x6   :  { %s36_s18 = sshll.u32 %s249_s17, 4  ;;  %s37_s18 = int_to_ptr.vmem [resolvable:$true] %s36_s18 }
   0x7   :  { %39 = dma.hbm_to_vmem [thread:$0]  %s35_s16, 1024, %s37_s18, [#allocation7]  }
   0x8   :  { %242 = dma.done.wait [#allocation4], 1024  }
   0x9   :  { %243 = vsyncadd [#allocation4], 4294966272 }
   0xa   :  { %244 = dma.done.wait [#allocation7], 1024  }
   0xb   :  { %245 = vsyncadd [#allocation7], 4294966272  ;;  %v62_v0 = vld [vmem:[#allocation3] sm:$0xff]  ;;  %v63_v1 = vld [vmem:[#allocation3 + $0x8] sm:$0xff]  ;;  %s250_s0 = smov [#allocation8]   ;;  %s154_s21 = sshll.u32 %s277_s2, 4  ;;  %s155_s21 = int_to_ptr.hbm [resolvable:$true] %s154_s21 }
   0xc   :  { %v64_v2 = vld [vmem:[#allocation3 + $0x10] sm:$0xff]  ;;  %v65_v3 = vld [vmem:[#allocation3 + $0x18] sm:$0xff]  ;;  %v66_v4 = vld [vmem:[#allocation3 + $0x20] sm:$0xff]  ;;  %s152_s1 = sshll.u32 %s250_s0, 4  ;;  %s153_s1 = int_to_ptr.vmem [resolvable:$true] %s152_s1 }
   0xd   :  { %v70_v5 = vld [vmem:[#allocation6] sm:$0xff]  ;;  %v71_v6 = vld [vmem:[#allocation6 + $0x8] sm:$0xff]  ;;  %v72_v7 = vld [vmem:[#allocation6 + $0x10] sm:$0xff] }
   0xe   :  { %v73_v8 = vld [vmem:[#allocation6 + $0x18] sm:$0xff]  ;;  %v78_v9 = vsub.f32 %v62_v0, %v70_v5  ;;  %v74_v10 = vld [vmem:[#allocation6 + $0x20] sm:$0xff]  ;;  %v79_v11 = vsub.f32 %v63_v1, %v71_v6  ;;  %v80_v12 = vsub.f32 %v64_v2, %v72_v7  ;;  %v67_v14 = vld [vmem:[#allocation3 + $0x28] sm:$0xff] }
   0xf   :  { %v81_v13 = vsub.f32 %v65_v3, %v73_v8  ;;  %v75_v15 = vld [vmem:[#allocation6 + $0x28] sm:$0xff]  ;;  %v82_v17 = vsub.f32 %v66_v4, %v74_v10  ;;  %v68_v20 = vld [vmem:[#allocation3 + $0x30] sm:$0xff]  ;;  %v69_v25 = vld [vmem:[#allocation3 + $0x38] sm:$0xff] }
  0x10   :  { %v94_v16 = vmul.f32 %v78_v9, %v78_v9  ;;  %v95_v18 = vmul.f32 %v79_v11, %v79_v11  ;;  %v96_v19 = vmul.f32 %v80_v12, %v80_v12  ;;  %v76_v21 = vld [vmem:[#allocation6 + $0x30] sm:$0xff]  ;;  %v83_v22 = vsub.f32 %v67_v14, %v75_v15  ;;  %v77_v26 = vld [vmem:[#allocation6 + $0x38] sm:$0xff] }
  0x11   :  { %v97_v23 = vmul.f32 %v81_v13, %v81_v13  ;;  %v84_v27 = vsub.f32 %v68_v20, %v76_v21  ;;  %v98_v28 = vmul.f32 %v82_v17, %v82_v17  ;;  %v85_v30 = vsub.f32 %v69_v25, %v77_v26 }
  0x12   :  { %v129_v24 = vadd.f32 %v95_v18, %v94_v16  ;;  %v99_v31 = vmul.f32 %v83_v22, %v83_v22 }
  0x13   :  { %v100_v33 = vmul.f32 %v84_v27, %v84_v27  ;;  %v101_v35 = vmul.f32 %v85_v30, %v85_v30 }
  0x14   :  { %v130_v29 = vadd.f32 %v129_v24, %v96_v19 }
  0x16   :  { %v131_v32 = vadd.f32 %v130_v29, %v97_v23 }
  0x18   :  { %v132_v34 = vadd.f32 %v131_v32, %v98_v28 }
  0x1a   :  { %v133_v36 = vadd.f32 %v132_v34, %v99_v31 }
  0x1c   :  { %v134_v37 = vadd.f32 %v133_v36, %v100_v33 }
  0x1e   :  { %v135_v38 = vadd.f32 %v134_v37, %v101_v35 }
  0x20   :  { %136 = vadd.xlane.f32.xlu0 %v135_v38 }
  0x93   :  { %v137_v39 = vpop.xlane.xlu0 %136 }
  0x94   :  { %v138_v40 = vrot.slane %v137_v39, 4 }
  0x96   :  { %v139_v41 = vadd.f32 %v138_v40, %v137_v39 }
  0x98   :  { %v140_v42 = vrot.slane %v139_v41, 2 }
  0x9a   :  { %v141_v43 = vadd.f32 %v140_v42, %v139_v41 }
  0x9c   :  { %v142_v44 = vrot.slane %v141_v43, 1 }
  0x9e   :  { %v143_v45 = vadd.f32 %v142_v44, %v141_v43 }
  0xa0   :  { %165 = vpush %v143_v45 }
  0xd1   :  { %s166_s22 = spop %165 }
  0xd2   :  { %v145_v46 = vstv %s166_s22 }
  0xd3   :  { %146 = vst [vmem:[#allocation8] sm:$0xff] %v145_v46 }
  0xd4   :  { %157 = dma.vmem_to_hbm [thread:$0]  %s153_s1, 128, %s155_s21, [#allocation5]  }
  0xd5   :  { %246 = dma.done.wait [#allocation5], 128  }
  0xd6   :  { %247 = vsyncadd [#allocation5], 4294967168 }
  0xd7   :  { %162 = vsyncpa [#allocation4], 1 }
  0xd8   :  { %163 = vsyncpa [#allocation7], 1 }
  0xd9   :  { %164 = vsyncpa [#allocation5], 1 }

</bundles_post_ra>
